<compile_context>
chip_gen: v7x
topology: tpu7x:2x2x1
jax: 0.10.0
libtpu: 0.0.40
codegen_flags: <defaults>
</compile_context>

<pallas_src>
import jax
import jax.numpy as jnp
from jax.experimental import pallas as pl
from jax.experimental.pallas import tpu as pltpu

BN_EPS = 1e-5


# ----------------------------------------------------------------------------
# kernel helpers
# ----------------------------------------------------------------------------
def _accumulate_stats(y_f32, s1_ref, s2_ref):
    """Accumulate per-channel sum / sum-of-squares for ONE batch element.

    The stats blocks are indexed only by the batch grid axis, so they stay
    resident in VMEM across the inner ("arbitrary") point-tile axis and are
    written back once per batch element.  Because every batch element owns its
    own partial, the batch axis itself can be marked "parallel" (megacore)
    without racing the accumulation.
    """
    @pl.when(pl.program_id(1) == 0)
    def _():
        s1_ref[...] = jnp.zeros_like(s1_ref)
        s2_ref[...] = jnp.zeros_like(s2_ref)

    s1_ref[...] += jnp.sum(y_f32, axis=1, keepdims=True)
    s2_ref[...] += jnp.sum(y_f32 * y_f32, axis=1, keepdims=True)


def _bn_scale_shift(s1_ref, s2_ref, g_ref, be_ref, inv_count):
    """Fuse training-mode BatchNorm into one per-channel FMA (f32):
       (y - mean) * rsqrt(var+eps) * g + be  ==  y * scale + shift."""
    mean = s1_ref[...] * inv_count                                   # (C, 1)
    var = jnp.maximum(s2_ref[...] * inv_count - mean * mean, 0.0)    # E[x^2]-E[x]^2
    scale = g_ref[...] * jax.lax.rsqrt(var + BN_EPS)                 # EUP rsqrt
    shift = be_ref[...] - mean * scale
    return scale, shift


# ----------------------------------------------------------------------------
# per-layer kernels
# ----------------------------------------------------------------------------
def _make_first_layer_kernel():
    """conv1 (bias dropped - BN cancels it) + per-batch stats of its pre-acts."""
    def kernel(x_ref, w_ref, y_ref, s1_ref, s2_ref):
        # x already lives in the matmul dtype (cast fused with the pad in the
        # wrapper); padded point columns are exact zeros, so the conv output is
        # exactly zero there and the statistics need no masking in this layer.
        y = jnp.dot(w_ref[...], x_ref[...], preferred_element_type=jnp.float32)
        y_ref[...] = y.astype(y_ref.dtype)
        _accumulate_stats(y, s1_ref, s2_ref)
    return kernel


def _make_hidden_layer_kernel(matmul_dtype, ew_dtype, inv_count,
                              n_tile, n_valid, mask_pad):
    """BN(prev) + ReLU fused with the next 1x1 conv, plus per-batch stats."""
    def kernel(s1p_ref, s2p_ref, g_ref, be_ref, yin_ref, w_ref,
               y_ref, s1_ref, s2_ref):
        scale, shift = _bn_scale_shift(s1p_ref, s2p_ref, g_ref, be_ref,
                                       inv_count)
        # elementwise path in ew_dtype (bf16 on v6e/v7x halves VALU work and
        # vreg pressure); the statistics below stay f32.
        h = jnp.maximum(
            yin_ref[...].astype(ew_dtype) * scale.astype(ew_dtype)
            + shift.astype(ew_dtype),
            jnp.zeros((), ew_dtype))
        y = jnp.dot(w_ref[...], h.astype(matmul_dtype),
                    preferred_element_type=jnp.float32)
        y_ref[...] = y.astype(y_ref.dtype)          # stored unmasked
        if mask_pad:
            # Mask only the (c_out, n_tile) stats input (half the rows of h).
            # Padded columns of the stored y are garbage but are re-masked
            # before the next layer's stats / sliced off at the end, so they
            # never reach the real output or the statistics.
            lane = jax.lax.broadcasted_iota(jnp.int32, (1, n_tile), 1)
            y = jnp.where(pl.program_id(1) * n_tile + lane < n_valid, y, 0.0)
        _accumulate_stats(y, s1_ref, s2_ref)
    return kernel


def _make_output_layer_kernel(matmul_dtype, ew_dtype, inv_count):
    """BN(prev) + ReLU + conv4 (with bias) + tanh; lane-dense (3, n_tile)."""
    def kernel(s1p_ref, s2p_ref, g_ref, be_ref, yin_ref, w_ref, b_ref, o_ref):
        scale, shift = _bn_scale_shift(s1p_ref, s2p_ref, g_ref, be_ref,
                                       inv_count)
        h = jnp.maximum(
            yin_ref[...].astype(ew_dtype) * scale.astype(ew_dtype)
            + shift.astype(ew_dtype),
            jnp.zeros((), ew_dtype))
        y = jnp.dot(w_ref[...], h.astype(matmul_dtype),
                    preferred_element_type=jnp.float32) + b_ref[...]
        o_ref[...] = jnp.tanh(y).astype(o_ref.dtype)
    return kernel


# ----------------------------------------------------------------------------
# wrapper
# ----------------------------------------------------------------------------
def pointgencon_forward(x_ncl, params, *, n_tile=512,
                        matmul_dtype=jnp.bfloat16, elementwise_dtype=None,
                        vmem_limit_bytes=None):
    """x_ncl: (B, C, N) f32 (PyTorch Conv1d NCL layout).  Returns (B, 3, N) f32.

    n_tile: points per grid step (lane tile, multiple of 128).  Production
      guide (C~1024, bf16 intermediates): v5e <= 512 (16 MiB scoped VMEM),
      v6e 1024-2048 (set vmem_limit_bytes above ~1024), v7x ~1024 max.
    matmul_dtype: MXU-input / HBM-intermediate dtype.  bf16 recommended on ALL
      generations (MXU accumulation and BN statistics stay f32); f32 operands
      are ~3x slower on the v5e MXU and double intermediate HBM traffic.
    elementwise_dtype: dtype of the BN scale/shift + ReLU math.  Defaults to
      matmul_dtype (bf16 on v6e/v7x).  Pass jnp.float32 on v5e (no bf16 VPU).
    vmem_limit_bytes: optional Mosaic scoped-VMEM override for large n_tile.
    """
    if n_tile % 128:
        raise ValueError("n_tile must be a multiple of 128 (lane width)")
    ew_dtype = matmul_dtype if elementwise_dtype is None else elementwise_dtype
    (w1, _b1, g1, be1, w2, _b2, g2, be2, w3, _b3, g3, be3, w4, b4) = params
    B, C, N = x_ncl.shape
    n_pad = pl.cdiv(N, n_tile) * n_tile
    mask_pad = n_pad != N

    # Cast to the matmul dtype in the wrapper (fused with the pad by XLA):
    # halves layer-1 HBM reads and removes a per-tile cast from the kernel.
    # Padded columns stay exact zeros (layer-1 stats rely on this).
    x = x_ncl.astype(matmul_dtype)
    if mask_pad:
        x = jnp.pad(x, ((0, 0), (0, 0), (0, n_pad - N)))

    grid = (B, n_pad // n_tile)
    inv_count = 1.0 / (B * N)              # BN stats over batch * true points
    act_dtype = matmul_dtype               # HBM dtype of intermediate slabs

    # conv1..3 biases are intentionally NOT used: BatchNorm cancels them.
    w1c, w2c, w3c, w4c = (w.astype(matmul_dtype) for w in (w1, w2, w3, w4))

    def tile_spec(c):                      # (B, c, n_pad) -> (c, n_tile) tile
        return pl.BlockSpec((None, c, n_tile), lambda b, n: (b, 0, n))

    def full_spec(shape):
        # Small operand with a constant block index: stays resident across the
        # grid.  (On JAX versions that honor pipeline_mode, adding
        # pl.Buffered(1) here single-buffers these operands and frees a few
        # MiB of VMEM per layer; omitted for portability.)
        return pl.BlockSpec(shape, lambda b, n: tuple(0 for _ in shape))

    def stats_spec(c):                     # per-batch partial stats block
        return pl.BlockSpec((None, c, 1), lambda b, n: (b, 0, 0))

    def stats_out(c):
        return ([jax.ShapeDtypeStruct((B, c, 1), jnp.float32)] * 2,
                [stats_spec(c)] * 2)

    def cparams(point_axis):
        # batch axis is always "parallel": per-batch stats make it race-free,
        # which unlocks megacore on v7x for layers 1-3 as well.
        return pltpu.CompilerParams(
            dimension_semantics=("parallel", point_axis),
            vmem_limit_bytes=vmem_limit_bytes)

    def itemsize(dt):
        return jnp.dtype(dt).itemsize

    def cost(ci, co, in_dt, out_dt, transcendentals=0):
        return pl.CostEstimate(
            flops=2 * ci * co * B * n_pad + 6 * (ci + co) * B * n_pad,
            transcendentals=int(transcendentals),
            bytes_accessed=B * n_pad * (ci * itemsize(in_dt)
                                        + co * itemsize(out_dt))
                           + ci * co * itemsize(matmul_dtype))

    def combine(s):                        # (B, c, 1) partials -> (c, 1) f32
        return jnp.sum(s, axis=0)

    # ---- layer 1: conv1 + per-batch stats ----------------------------------
    s_shapes, s_specs = stats_out(C)
    y1, s1a, s1b = pl.pallas_call(
        _make_first_layer_kernel(),
        grid=grid,
        in_specs=[tile_spec(C), full_spec(w1c.shape)],
        out_specs=[tile_spec(C)] + s_specs,
        out_shape=[jax.ShapeDtypeStruct((B, C, n_pad), act_dtype)] + s_shapes,
        compiler_params=cparams("arbitrary"),
        cost_estimate=cost(C, C, matmul_dtype, act_dtype),
    )(x, w1c)

    # ---- layers 2 & 3: BN+ReLU(prev) -> conv -> per-batch stats -------------
    hidden_kernel = _make_hidden_layer_kernel(matmul_dtype, ew_dtype,
                                              inv_count, n_tile, N, mask_pad)

    def hidden_layer(y_in, s1, s2, g, be, w, c_in, c_out):
        s_shapes, s_specs = stats_out(c_out)
        s1c, s2c = combine(s1), combine(s2)
        return pl.pallas_call(
            hidden_kernel,
            grid=grid,
            in_specs=[full_spec(s1c.shape), full_spec(s2c.shape),
                      full_spec(g.shape), full_spec(be.shape),
                      tile_spec(c_in), full_spec(w.shape)],
            out_specs=[tile_spec(c_out)] + s_specs,
            out_shape=[jax.ShapeDtypeStruct((B, c_out, n_pad), act_dtype)]
                      + s_shapes,
            compiler_params=cparams("arbitrary"),
            cost_estimate=cost(c_in, c_out, act_dtype, act_dtype,
                               transcendentals=c_in),
        )(s1c, s2c, g, be, y_in, w)

    y2, s2a, s2b = hidden_layer(y1, s1a, s1b, g1, be1, w2c, C, C // 2)
    y3, s3a, s3b = hidden_layer(y2, s2a, s2b, g2, be2, w3c, C // 2, C // 4)

    # ---- layer 4: BN+ReLU(prev) -> conv4 + bias -> tanh ---------------------
    s3ac, s3bc = combine(s3a), combine(s3b)
    out = pl.pallas_call(
        _make_output_layer_kernel(matmul_dtype, ew_dtype, inv_count),
        grid=grid,
        in_specs=[full_spec(s3ac.shape), full_spec(s3bc.shape),
                  full_spec(g3.shape), full_spec(be3.shape),
                  tile_spec(C // 4), full_spec(w4c.shape), full_spec(b4.shape)],
        out_specs=tile_spec(3),
        out_shape=jax.ShapeDtypeStruct((B, 3, n_pad), jnp.float32),
        compiler_params=cparams("parallel"),   # no accumulation: fully parallel
        cost_estimate=cost(C // 4, 3, act_dtype, jnp.float32,
                           transcendentals=3 * B * n_pad),
    )(s3ac, s3bc, g3, be3, y3, w4c, b4)

    return out[:, :, :N] if mask_pad else out


# ----------------------------------------------------------------------------
# pure-JAX reference (mirrors the PyTorch forward, training-mode BN, f32)
# ----------------------------------------------------------------------------
def pointgencon_reference(x, params):
    (w1, b1, g1, be1, w2, b2, g2, be2, w3, b3, g3, be3, w4, b4) = params

    def conv(h, w, b):                       # 1x1 Conv1d, NCL layout
        return jnp.einsum('oc,bcn->bon', w, h) + b[None]

    def bn(y, g, be):                        # BatchNorm1d, batch statistics
        mean = jnp.mean(y, axis=(0, 2), keepdims=True)
        var = jnp.mean((y - mean) ** 2, axis=(0, 2), keepdims=True)
        return (y - mean) / jnp.sqrt(var + BN_EPS) * g[None] + be[None]

    h = jax.nn.relu(bn(conv(x, w1, b1), g1, be1))
    h = jax.nn.relu(bn(conv(h, w2, b2), g2, be2))
    h = jax.nn.relu(bn(conv(h, w3, b3), g3, be3))
    return jnp.tanh(conv(h, w4, b4))


def init_params(key, bottleneck_size):
    """Synthetic parameters with the shapes the nn.Module implies.

    Conv1d(ci, co, 1).weight is (co, ci, 1); stored as (co, ci) so the kernel
    computes y = W @ x directly in NCL layout.  Conv biases and BN gamma/beta
    are (co, 1) columns (per-channel, broadcast over points).
    """
    c = bottleneck_size
    dims = [(c, c), (c, c // 2), (c // 2, c // 4), (c // 4, 3)]
    keys = jax.random.split(key, 4 * len(dims))
    params = []
    for i, (ci, co) in enumerate(dims):
        kw, kb, kg, kbe = keys[4 * i:4 * i + 4]
        bound = 1.0 / jnp.sqrt(ci)
        w = jax.random.uniform(kw, (co, ci), jnp.float32, -bound, bound)
        b = jax.random.uniform(kb, (co, 1), jnp.float32, -bound, bound)
        params += [w, b]
        if i < 3:                       # BN follows the first three convs only
            g = 1.0 + 0.1 * jax.random.normal(kg, (co, 1), jnp.float32)
            be = 0.1 * jax.random.normal(kbe, (co, 1), jnp.float32)
            params += [g, be]
    return tuple(params)


if __name__ == "__main__":
    key = jax.random.PRNGKey(0)
    k_x, k_p = jax.random.split(key)

    bottleneck_size = 32          # must be divisible by 4
    B, N = 2, 200                 # N not a multiple of the lane tile:
                                  # exercises the padded/masked stats path

    x = jax.random.normal(k_x, (B, bottleneck_size, N), jnp.float32)
    params = init_params(k_p, bottleneck_size)
    ref = pointgencon_reference(x, params)

    # exact path (f32 matmuls + f32 elementwise) with a small tile so the
    # multi-tile stats accumulation AND the padding mask are both exercised.
    out_f32 = jax.block_until_ready(
        pointgencon_forward(x, params, n_tile=128,
                            matmul_dtype=jnp.float32,
                            elementwise_dtype=jnp.float32))
    assert out_f32.shape == (B, 3, N), out_f32.shape
    err_f32 = float(jnp.max(jnp.abs(out_f32 - ref)))
    assert err_f32 < 1e-3, err_f32

    # default fast path: bf16 MXU inputs / HBM intermediates / elementwise,
    # f32 MXU accumulation and f32 BN statistics, n_tile=512 (v6e/v7x default).
    out_bf16 = jax.block_until_ready(pointgencon_forward(x, params))
    assert out_bf16.shape == (B, 3, N), out_bf16.shape
    err_bf16 = float(jnp.max(jnp.abs(out_bf16 - ref)))
    assert err_bf16 < 2e-1, err_bf16

    print("KERNEL_OK")
</pallas_src>

<mosaic_0001>
module attributes {stable_mosaic.version = 11 : i64} {
  func.func @kernel(%arg0: i32, %arg1: i32, %arg2: memref<1x32x128xf32, #tpu.memory_space<vmem>>, %arg3: memref<32x32xf32, #tpu.memory_space<vmem>>, %arg4: memref<1x32x128xf32, #tpu.memory_space<vmem>>, %arg5: memref<1x32x1xf32, #tpu.memory_space<vmem>>, %arg6: memref<1x32x1xf32, #tpu.memory_space<vmem>>) attributes {dimension_semantics = [#tpu.dimension_semantics<parallel>, #tpu.dimension_semantics<arbitrary>], iteration_bounds = array<i64: 2, 2>, scalar_prefetch = 0 : i64, scratch_operands = 0 : i64, tpu.core_type = #tpu.core_type<tc>, window_params = [{transform_indices = @transform_0, window_bounds = array<i64: 1, 32, 128>}, {pipeline_mode = #tpu.pipeline_mode<synchronous>, transform_indices = @transform_1, window_bounds = array<i64: 32, 32>}, {transform_indices = @transform_2, window_bounds = array<i64: 1, 32, 128>}, {transform_indices = @transform_3, window_bounds = array<i64: 1, 32, 1>}, {transform_indices = @transform_4, window_bounds = array<i64: 1, 32, 1>}]} {
    %c0 = arith.constant 0 : index
    %c0_0 = arith.constant 0 : index
    %0 = vector.load %arg3[%c0, %c0_0] : memref<32x32xf32, #tpu.memory_space<vmem>>, vector<32x32xf32>
    %c0_1 = arith.constant 0 : index
    %c0_2 = arith.constant 0 : index
    %c0_3 = arith.constant 0 : index
    %1 = vector.load %arg2[%c0_1, %c0_2, %c0_3] : memref<1x32x128xf32, #tpu.memory_space<vmem>>, vector<1x32x128xf32>
    %2 = vector.shape_cast %1 : vector<1x32x128xf32> to vector<32x128xf32>
    %cst = arith.constant dense<0.000000e+00> : vector<32x128xf32>
    %3 = tpu.matmul %0, %2, %cst {dimension_numbers = #tpu.dot_dimension_numbers<[1], [0], [0], [1], [0, 0, 1, 1], [], []>} : vector<32x32xf32>, vector<32x128xf32>, vector<32x128xf32> -> vector<32x128xf32>
    %c0_4 = arith.constant 0 : index
    %c0_5 = arith.constant 0 : index
    %c0_6 = arith.constant 0 : index
    %4 = vector.load %arg4[%c0_4, %c0_5, %c0_6] : memref<1x32x128xf32, #tpu.memory_space<vmem>>, vector<1x32x128xf32>
    %5 = vector.shape_cast %4 : vector<1x32x128xf32> to vector<32x128xf32>
    %6 = vector.shape_cast %3 : vector<32x128xf32> to vector<1x32x128xf32>
    tpu.vector_store %arg4[%c0_4, %c0_5, %c0_6], %6 {strides = array<i32>} : memref<1x32x128xf32, #tpu.memory_space<vmem>>, vector<1x32x128xf32>,
    %c0_i32 = arith.constant 0 : i32
    %7 = arith.cmpi eq, %arg1, %c0_i32 : i32
    %8 = arith.extui %7 : i1 to i32
    %c0_i32_7 = arith.constant 0 : i32
    %9 = arith.cmpi ne, %8, %c0_i32_7 : i32
    scf.if %9 {
      %cst_22 = arith.constant 0.000000e+00 : f32
      %27 = vector.broadcast %cst_22 : f32 to vector<32x1xf32>
      %c0_23 = arith.constant 0 : index
      %c0_24 = arith.constant 0 : index
      %c0_25 = arith.constant 0 : index
      %28 = vector.load %arg5[%c0_23, %c0_24, %c0_25] : memref<1x32x1xf32, #tpu.memory_space<vmem>>, vector<1x32x1xf32>
      %29 = vector.shape_cast %28 : vector<1x32x1xf32> to vector<32x1xf32>
      %30 = vector.shape_cast %27 : vector<32x1xf32> to vector<1x32x1xf32>
      tpu.vector_store %arg5[%c0_23, %c0_24, %c0_25], %30 {strides = array<i32>} : memref<1x32x1xf32, #tpu.memory_space<vmem>>, vector<1x32x1xf32>,
      %cst_26 = arith.constant 0.000000e+00 : f32
      %31 = vector.broadcast %cst_26 : f32 to vector<32x1xf32>
      %c0_27 = arith.constant 0 : index
      %c0_28 = arith.constant 0 : index
      %c0_29 = arith.constant 0 : index
      %32 = vector.load %arg6[%c0_27, %c0_28, %c0_29] : memref<1x32x1xf32, #tpu.memory_space<vmem>>, vector<1x32x1xf32>
      %33 = vector.shape_cast %32 : vector<1x32x1xf32> to vector<32x1xf32>
      %34 = vector.shape_cast %31 : vector<32x1xf32> to vector<1x32x1xf32>
      tpu.vector_store %arg6[%c0_27, %c0_28, %c0_29], %34 {strides = array<i32>} : memref<1x32x1xf32, #tpu.memory_space<vmem>>, vector<1x32x1xf32>,
    } else {
    }
    %c0_8 = arith.constant 0 : index
    %c0_9 = arith.constant 0 : index
    %c0_10 = arith.constant 0 : index
    %10 = vector.load %arg5[%c0_8, %c0_9, %c0_10] : memref<1x32x1xf32, #tpu.memory_space<vmem>>, vector<1x32x1xf32>
    %11 = vector.shape_cast %10 : vector<1x32x1xf32> to vector<32x1xf32>
    %cst_11 = arith.constant dense<0.000000e+00> : vector<32xf32>
    %12 = vector.multi_reduction <add>, %3, %cst_11 [1] : vector<32x128xf32> to vector<32xf32>
    %13 = vector.shape_cast %12 : vector<32xf32> to vector<32x1xf32>
    %14 = arith.addf %11, %13 : vector<32x1xf32>
    %c0_12 = arith.constant 0 : index
    %c0_13 = arith.constant 0 : index
    %c0_14 = arith.constant 0 : index
    %15 = vector.load %arg5[%c0_12, %c0_13, %c0_14] : memref<1x32x1xf32, #tpu.memory_space<vmem>>, vector<1x32x1xf32>
    %16 = vector.shape_cast %15 : vector<1x32x1xf32> to vector<32x1xf32>
    %17 = vector.shape_cast %14 : vector<32x1xf32> to vector<1x32x1xf32>
    tpu.vector_store %arg5[%c0_12, %c0_13, %c0_14], %17 {strides = array<i32>} : memref<1x32x1xf32, #tpu.memory_space<vmem>>, vector<1x32x1xf32>,
    %c0_15 = arith.constant 0 : index
    %c0_16 = arith.constant 0 : index
    %c0_17 = arith.constant 0 : index
    %18 = vector.load %arg6[%c0_15, %c0_16, %c0_17] : memref<1x32x1xf32, #tpu.memory_space<vmem>>, vector<1x32x1xf32>
    %19 = vector.shape_cast %18 : vector<1x32x1xf32> to vector<32x1xf32>
    %20 = arith.mulf %3, %3 : vector<32x128xf32>
    %cst_18 = arith.constant dense<0.000000e+00> : vector<32xf32>
    %21 = vector.multi_reduction <add>, %20, %cst_18 [1] : vector<32x128xf32> to vector<32xf32>
    %22 = vector.shape_cast %21 : vector<32xf32> to vector<32x1xf32>
    %23 = arith.addf %19, %22 : vector<32x1xf32>
    %c0_19 = arith.constant 0 : index
    %c0_20 = arith.constant 0 : index
    %c0_21 = arith.constant 0 : index
    %24 = vector.load %arg6[%c0_19, %c0_20, %c0_21] : memref<1x32x1xf32, #tpu.memory_space<vmem>>, vector<1x32x1xf32>
    %25 = vector.shape_cast %24 : vector<1x32x1xf32> to vector<32x1xf32>
    %26 = vector.shape_cast %23 : vector<32x1xf32> to vector<1x32x1xf32>
    tpu.vector_store %arg6[%c0_19, %c0_20, %c0_21], %26 {strides = array<i32>} : memref<1x32x1xf32, #tpu.memory_space<vmem>>, vector<1x32x1xf32>,
    return
  }
  func.func @transform_0(%arg0: i32, %arg1: i32) -> (i32, i32, i32) {
    %c0_i32 = arith.constant 0 : i32
    %c0_i32_0 = arith.constant 0 : i32
    return %arg0, %c0_i32, %arg1 : i32, i32, i32
  }
  func.func @transform_1(%arg0: i32, %arg1: i32) -> (i32, i32) {
    %c0_i32 = arith.constant 0 : i32
    %c0_i32_0 = arith.constant 0 : i32
    %c0_i32_1 = arith.constant 0 : i32
    return %c0_i32, %c0_i32_0 : i32, i32
  }
  func.func @transform_2(%arg0: i32, %arg1: i32) -> (i32, i32, i32) {
    %c0_i32 = arith.constant 0 : i32
    %c0_i32_0 = arith.constant 0 : i32
    return %arg0, %c0_i32, %arg1 : i32, i32, i32
  }
  func.func @transform_3(%arg0: i32, %arg1: i32) -> (i32, i32, i32) {
    %c0_i32 = arith.constant 0 : i32
    %c0_i32_0 = arith.constant 0 : i32
    %c0_i32_1 = arith.constant 0 : i32
    return %arg0, %c0_i32, %c0_i32_0 : i32, i32, i32
  }
  func.func @transform_4(%arg0: i32, %arg1: i32) -> (i32, i32, i32) {
    %c0_i32 = arith.constant 0 : i32
    %c0_i32_0 = arith.constant 0 : i32
    %c0_i32_1 = arith.constant 0 : i32
    return %arg0, %c0_i32, %c0_i32_0 : i32, i32, i32
  }
}

</mosaic_0001>

<bundles_post_ra>
// kernel: tpu_custom_call.1
= control target key start
LH: loop header
LB: loop body
LE: loop exit
PB: predicated region body
PF: predicated region fallthrough
CT: control target
= control target key end

     0   :  { %s1282_s0 = inlined_call_operand.hbm [shape: f32[2,32,256], index: 0, kind: input, shape index: {}]   ;;  %s1283_s1 = inlined_call_operand.hbm [shape: f32[32,32], index: 1, kind: input, shape index: {}]   ;;  %s1284_s2 = inlined_call_operand.hbm [shape: f32[2,32,256], index: 2, kind: output, shape index: {0}]   ;;  %s1285_s3 = inlined_call_operand.vmem [shape: f32[2,32,1], index: 3, kind: output, shape index: {1}]   ;;  %s1286_s4 = inlined_call_operand.vmem [shape: f32[2,32,1], index: 4, kind: output, shape index: {2}]  }
   0x1   :  { %1297 = sst [smem:[#allocation13_spill]] %s1283_s1 }
   0x2   :  { %10 = vsyncpa [#allocation3], 0 }
   0x3   :  { %12 = vsyncpa [#allocation3 + $0x1], 0 }
   0x4   :  { %13 = vsyncpa [#allocation6], 0 }
   0x5   :  { %14 = vsyncpa [#allocation4], 0 }
   0x6   :  { %16 = vsyncpa [#allocation4 + $0x1], 0  ;;  %s975_s15 = smov 0   ;;  %s977_s16 = smov 0  }
   0x7   :  { %s979_s17 = smov 0   ;;  %s981_s18 = smov 0  }
   0x8   :  { %s983_s19 = smov 0   ;;  %s985_s20 = smov 0  }
   0x9   :  { %s987_s21 = smov 0   ;;  %s989_s22 = smov 0  }
   0xa LB: > { %s620_s23 = sadd.s32 4294967295, %s938_s22   ;;  %s621_s24 = sadd.s32 4294967294, %s938_s22   ;;  %s938_s22 = sphi %s989_s22, %s22_s22   ;;  %s934_s21 = sphi %s987_s21, %s1326_s21   ;;  %s930_s20 = sphi %s985_s20, %s1325_s20   ;;  %s926_s19 = sphi %s983_s19, %s1324_s19   ;;  %s922_s18 = sphi %s981_s18, %s1323_s18   ;;  %s918_s17 = sphi %s979_s17, %s1322_s17   ;;  %s914_s16 = sphi %s977_s16, %s1321_s16   ;;  %s910_s15 = sphi %s975_s15, %s1320_s15  }
   0xb   : > { %p50_p0 = scmp.ne.s32.totalorder %s918_s17, %s914_s16  ;;  %p51_p1 = scmp.eq.s32.totalorder %s938_s22, 0 }
   0xc   : > { %p56_p2 = scmp.ne.s32.totalorder %s914_s16, %s910_s15  ;;  %p1023_p3 = scmp.eq.s32.totalorder %s620_s23, 0 }
   0xd   : > { %p103_p4 = scmp.eq.s32.totalorder %s620_s23, 3  ;;  %p1027_p5 = por %p51_p1, %p50_p0 }
   0xe   : > { %s1298_s26 = scalar_select %p1023_p3, 1, 0 }
   0xf   : > { %p109_p6 = scmp.eq.s32.totalorder %s621_s24, 3  ;;  %p1033_p7 = por %p1023_p3, %p56_p2 }
  0x10   : > { %p1037_p8 = por %p103_p4, %p50_p0  ;;  %p622_p10 = scmp.ge.s32.totalorder %s938_s22, 1 }
  0x11   : > { %s1300_s28 = scalar_select %p1033_p7, 1, 0 }
  0x12   : > { %s1301_s29 = scalar_select %p1037_p8, 1, 0 }
  0x13   : > { %p1041_p9 = por %p109_p6, %p56_p2  ;;  %p168_p11 = scmp.lt.s32.totalorder %s938_s22, 5 }
  0x14   : > { %s940_s6 = smov [#allocation5]   ;;  %p703_p0 = scmp.lt.s32.totalorder %s938_s22, 4 }
  0x15   : > { %s1302_s30 = scalar_select %p1041_p9, 1, 0 }
  0x16   : > { %p1047_p12 = pnand %p622_p10, %p168_p11  ;;  %s180_s7 = sshll.u32 %s940_s6, 4  ;;  %s181_s7 = int_to_ptr.vmem [resolvable:$true] %s180_s7 }
  0x17   : > { %1303 = sst [smem:[#allocation11_spill]] %s1302_s30  ;;  %p1062_p2 = pnand %p703_p0, %p1027_p5 }
  0x18   : > { %s1304_s5 = scalar_select %p1047_p12, 1, 0 }
  0x19   : > { %p690_p13 = pneg %p1047_p12  ;;  %s1307_s1 = sld [smem:[#allocation13_spill]] }
  0x1a   : > { %s1306_s9 = scalar_select %p1062_p2, 1, 0 }
  0x1b   : > { %p1056_p1 = pnand %p690_p13, %p1023_p3 }
  0x1d   : > { %p780_p6 = pneg %p1056_p1 }
  0x1f   : > { %s778_s12 = scalar_lea.hbm %s1307_s1, 512 }
  0x20   : > { %p779_p4 = scmp.ne.s32.totalorder %s1307_s1, %s778_s12  ;;  %p785_p13 = scmp.lt.u32.totalorder %s778_s12, %s1307_s1 }
  0x22   : > { %p781_p10 = pnand %p780_p6, %p779_p4 }
  0x24   : > { %p782_p11 = pneg %p781_p10 }
  0x26   : > { %p787_p5 = pnand %p785_p13, %p782_p11 }
  0x28   : > { %790 = shalt.err (!%p787_p5)
}
  0x29   : > { %s791_s27 = scalar_lea.vmem %s181_s7, 512  ;;  %p799_p3 = scmp.lt.s32.totalorder %s181_s7, %s181_s7 }
  0x2a   : > { %p792_p0 = scmp.ne.s32.totalorder %s181_s7, %s791_s27  ;;  %p800_p7 = scmp.lt.s32.totalorder %s791_s27, %s791_s27 }
  0x2c   : > { %p794_p9 = pnand %p792_p0, %p780_p6  ;;  %p801_p12 = por %p800_p7, %p799_p3 }
  0x2e   : > { %p795_p8 = pneg %p794_p9 }
  0x30   : > { %p802_p2 = pnand %p801_p12, %p795_p8 }
  0x32   : > { %805 = shalt.err (!%p802_p2)
}
  0x33   : > { %s1293_s6 = smov 128   ;;  %s1294_s10 = smov 8  }
  0x34   : > { %693 = dma.hbm_to_vmem [thread:$0]  (!%p1056_p1), %s1307_s1, 512, %s181_s7, [#allocation6], %s1293_s6, %s1293_s6, %s1294_s10  }
  0x35   : > { %s31_s13 = sadd.s32 1, %s930_s20  ;;  %s34_s14 = sadd.s32 1, %s934_s21 }
  0x36   : > { %p32_p3 = scmp.ge.s32.totalorder %s31_s13, 2  ;;  %s194_s23 = sand.u32 1, %s918_s17  }
  0x37   : > { %s626_s24 = sshll.u32 %s934_s21, 3  ;;  %s625_s8 = sshll.u32 %s194_s23, 5 }
  0x38   : > { %s1328_s13 = smov (%p32_p3, %s31_s13), 0  ;;  %s1330_s14 = smov (!%p32_p3, %s34_s14), %s934_s21 }
  0x39   : > { %1308 = sst [smem:[#allocation12_spill]] %s1328_s13  ;;  %s39_s27 = ssub.s32 %s930_s20, %s1328_s13 }
  0x3a   : > { %p36_p7 = scmp.ge.s32.totalorder %s1330_s14, 2  ;;  %s203_s25 = sadd.s32 %s930_s20, %s626_s24 }
  0x3b   : > { %s627_s7 = sshll.u32 %s203_s25, 7  ;;  %s198_s11 = scalar_lea.vmem [#allocation2], %s625_s8 }
  0x3c   : > { %s1332_s14 = smov (%p36_p7, %s1330_s14), 0  ;;  %s206_s12 = sshll.u32 %s198_s11, 4  ;;  %s1106_s12 = int_to_ptr.vmem [resolvable:$true] %s206_s12 }
  0x3d   : > { %s38_s6 = ssub.s32 %s934_s21, %s1332_s14  ;;  %s1102_s30 = scalar_lea.hbm %s1282_s0, %s627_s7 }
  0x3e   : > { %s1104_s13 = sor.u32 %s39_s27, %s38_s6  ;;  %s1109_s24 = scalar_lea.sflag [#allocation3], %s194_s23 }
  0x3f   : > { %p41_p8 = scmp.eq.s32.totalorder %s1104_s13, 0  ;;  %s806_s25 = scalar_lea.hbm %s1102_s30, 512 }
  0x40   : > { %p807_p9 = scmp.ne.s32.totalorder %s1102_s30, %s806_s25  ;;  %p1309_p12 = scmp.ne.s32.totalorder %s1306_s9, 0 }
  0x41   : > { %s811_s8 = scalar_lea.hbm %s1282_s0, 2048  ;;  %p812_p6 = scmp.lt.u32.totalorder %s1102_s30, %s1282_s0 }
  0x42   : > { %p808_p1 = pneg %p1309_p12  ;;  %p813_p10 = scmp.lt.u32.totalorder %s811_s8, %s806_s25 }
  0x43   : > { %p815_p13 = scmp.lt.u32.totalorder %s806_s25, %s1102_s30 }
  0x44   : > { %p809_p2 = pnand %p808_p1, %p807_p9  ;;  %p814_p11 = por %p813_p10, %p812_p6 }
  0x46   : > { %p810_p4 = pneg %p809_p2  ;;  %p816_p5 = por %p815_p13, %p814_p11 }
  0x48   : > { %p817_p0 = pnand %p816_p5, %p810_p4 }
  0x4a   : > { %820 = shalt.err (!%p817_p0)
}
  0x4b   : > { %s821_s23 = scalar_lea.vmem %s1106_s12, 512  ;;  %s943_s7 = smov [#allocation2]  }
  0x4c   : > { %p822_p3 = scmp.ne.s32.totalorder %s1106_s12, %s821_s23  ;;  %s826_s11 = sshll.u32 %s943_s7, 4  ;;  %s827_s11 = int_to_ptr.vmem [resolvable:$false] %s826_s11 }
  0x4d   : > { %s828_s1 = scalar_lea.vmem %s827_s11, 1024  ;;  %p829_p2 = scmp.lt.s32.totalorder %s1106_s12, %s827_s11 }
  0x4e   : > { %p824_p7 = pnand %p822_p3, %p808_p1  ;;  %p830_p6 = scmp.lt.s32.totalorder %s828_s1, %s821_s23 }
  0x50   : > { %p825_p9 = pneg %p824_p7  ;;  %p831_p10 = por %p830_p6, %p829_p2 }
  0x52   : > { %p832_p11 = pnand %p831_p10, %p825_p9 }
  0x54   : > { %835 = shalt.err (!%p832_p11)
}
  0x55   : > { %s944_s25 = smov 256   ;;  %s1310_s10 = smov 8  }
  0x56   : > { %s1311_s8 = smov 128   ;;  %s1312_s6 = sadd.s32 1, %s918_s17 }
  0x57   : > { %697 = dma.hbm_to_vmem [thread:$0]  (!%p1309_p12), %s1102_s30, 512, %s1106_s12, %s1109_s24, %s944_s25, %s1311_s8, %s1310_s10  }
  0x58   : > { %s1144_s27 = scalar_select %p41_p8, %s918_s17, %s1312_s6  }
  0x59   : > { %p1313_p1 = scmp.ne.s32.totalorder %s1304_s5, 0 }
  0x5a   : > { %s1149_s23 = sand.u32 (!%p1313_p1), 1, %s914_s16   ;;  %p1314_p4 = scmp.ne.s32.totalorder (!%p1313_p1), %s1300_s28, 0 }
  0x5b   : > { %218 = sbr.rel (%p1313_p1) target bundleno = 485 (0x1e5), region = 28  ;;  %s629_s9 = sshll.u32 (!%p1313_p1), %s1149_s23, 5 }
  0x5c   : > { %s221_s7 = scalar_lea.sflag (!%p1313_p1), [#allocation3], %s1149_s23  ;;  %s224_s11 = scalar_lea.vmem (!%p1313_p1), [#allocation2], %s629_s9 }
  0x62   : > { %897 = dma.done.wait (%p1314_p4), %s221_s7, 512  }
  0x63   : > { %899 = vsyncadd (%p1314_p4), %s221_s7, 4294966784  ;;  %p1315_p8 = scmp.ne.s32.totalorder %s1298_s26, 0 }
  0x65   : > { %901 = dma.done.wait (%p1315_p8), [#allocation6], 512  }
  0x66   : > { %903 = vsyncadd (%p1315_p8), [#allocation6], 4294966784  ;;  %p263_p12 = scmp.lt.s32.totalorder %s926_s19, 1  ;;  %vm281_vm0 = vcmask 261120   ;;  %v277_v0 = vld [vmem:[%s224_s11] sm:$0xff]  ;;  %v278_v1 = vld [vmem:[%s224_s11 + $0x8] sm:$0xff] }
  0x67   : > { %v279_v2 = vld [vmem:[%s224_s11 + $0x10] sm:$0xff]  ;;  %v670_v3 = vpack.c.bf16 %v278_v1, %v277_v0  ;;  %v280_v4 = vld [vmem:[%s224_s11 + $0x18] sm:$0xff]  ;;  %v273_v5 = vld [vmem:[#allocation5] sm:$0xff]  ;;  %s1181_s26 = scalar_lea.vmem [#allocation7], %s629_s9  ;;  %p640_p13 = scmp.ne.s32.totalorder %s922_s18, 0 }
  0x68   : > { %s264_s30 = scalar_select %p263_p12, %s926_s19, 1  ;;  %v275_v6 = vld [vmem:[#allocation5 + $0x10] sm:$0xff]  ;;  %v674_v7 = vpack.c.bf16 %v280_v4, %v279_v2  ;;  %664 = vmatprep.mubr.msk.f32.mxu0 %vm281_vm0, %v273_v5  ;;  %v274_v8 = vld [vmem:[#allocation5 + $0x8] sm:$0xff]  ;;  %v276_v9 = vld [vmem:[#allocation5 + $0x18] sm:$0xff] }
  0x69   : > { %667 = vmatprep.mubr.msk.f32.mxu1 %vm281_vm0, %v275_v6  ;;  %671 = vmatprep.subr.bf16.mxu0 %v670_v3  ;;  %vm387_vm1 = vcmask (!%p640_p13), 7168   ;;  %v945_v14 = vmov (!%p640_p13), 0.0  }
  0x6a   : > { %s646_s5 = sshll.u32 %s264_s30, 5  ;;  %678 = vmatprep.subr.bf16.mxu1 %v670_v3  ;;  %673 = vmatpush3.bf16.msra.mxu0 %v670_v3 }
  0x6b   : > { %s1168_s24 = scalar_lea.vmem %s1285_s3, %s646_s5  ;;  %s1173_s28 = scalar_lea.vmem %s1286_s4, %s646_s5  ;;  %680 = vmatpush3.bf16.msra.mxu1 %v670_v3  ;;  %675 = vmatprep.subr.bf16.mxu0 %v674_v7 }
  0x6c   : > { %679 = vmatprep.subr.bf16.mxu1 %v674_v7  ;;  %388 = vst.msk [vmem:[%s1168_s24] sm:$0xff] (!%p640_p13), %vm387_vm1, %v945_v14  ;;  %389 = vst.msk [vmem:[%s1168_s24 + $0x8] sm:$0xff] (!%p640_p13), %vm387_vm1, %v945_v14 }
  0x6d   : > { %390 = vst.msk [vmem:[%s1168_s24 + $0x10] sm:$0xff] (!%p640_p13), %vm387_vm1, %v945_v14  ;;  %391 = vst.msk [vmem:[%s1168_s24 + $0x18] sm:$0xff] (!%p640_p13), %vm387_vm1, %v945_v14 }
  0x6e   : > { %677 = vmatpush3.bf16.msra.mxu0 %v674_v7  ;;  %392 = vst.msk [vmem:[%s1173_s28] sm:$0xff] (!%p640_p13), %vm387_vm1, %v945_v14  ;;  %393 = vst.msk [vmem:[%s1173_s28 + $0x8] sm:$0xff] (!%p640_p13), %vm387_vm1, %v945_v14 }
  0x6f   : > { %681 = vmatpush3.bf16.msra.mxu1 %v674_v7  ;;  %394 = vst.msk [vmem:[%s1173_s28 + $0x10] sm:$0xff] (!%p640_p13), %vm387_vm1, %v945_v14  ;;  %395 = vst.msk [vmem:[%s1173_s28 + $0x18] sm:$0xff] (!%p640_p13), %vm387_vm1, %v945_v14 }
  0x71   : > { %665 = vmatmul.mubr.msk.f32.vlgmr.msra.gmra.mrb[0].mxu0 %vm281_vm0, %v274_v8 }
  0x72   : > { %668 = vmatmul.mubr.msk.f32.vlgmr.msra.gmra.mrb[0].mxu1 %vm281_vm0, %v276_v9 }
 0x141   : > { %386 = sbr.rel (%p640_p13) target bundleno = 328 (0x148), region = 40 }
 0x144   : > { %v666_v10 = vpop.f32.mrb[0].mxu0 }
 0x145   : > { %v669_v11 = vpop.f32.mrb[0].mxu1  ;;  %380 = vst [vmem:[%s1181_s26 + $0x8] sm:$0xff] %v666_v10  ;;  %v360_v12 = vpop.f32.mrb[1].mxu0 }
 0x146   : > { %382 = vst [vmem:[%s1181_s26 + $0x18] sm:$0xff] %v669_v11  ;;  %v370_v13 = vpop.f32.mrb[1].mxu1  ;;  %379 = vst [vmem:[%s1181_s26] sm:$0xff] %v360_v12 }
 0x147   : > { %381 = vst [vmem:[%s1181_s26 + $0x10] sm:$0xff] %v370_v13 }
 0x148 PF: > { %404 = vadd.xlane.f32.xlu1 %v370_v13  ;;  %400 = vadd.xlane.f32.xlu0 %v360_v12  ;;  %v422_v15 = vmul.f32 %v666_v10, %v666_v10  ;;  %v421_v16 = vmul.f32 %v360_v12, %v360_v12  ;;  %v424_v17 = vmul.f32 %v669_v11, %v669_v11  ;;  %s642_s10 = sshll.u32 %s926_s19, 3  ;;  %s466_s9 = sshll.u32 %s1181_s26, 4  ;;  %s1204_s9 = int_to_ptr.vmem [resolvable:$true] %s466_s9 }
 0x149   : > { %v423_v18 = vmul.f32 %v370_v13, %v370_v13  ;;  %s463_s8 = sadd.s32 %s922_s18, %s642_s10  ;;  %s442_s5 = scalar_lea.sflag [#allocation4], %s1149_s23 }
 0x14a   : > { %s643_s6 = sshll.u32 %s463_s8, 7  ;;  %s836_s13 = scalar_lea.vmem %s1204_s9, 512 }
 0x14b   : > { %s1202_s30 = scalar_lea.hbm %s1284_s2, %s643_s6  ;;  %p837_p5 = scmp.ne.s32.totalorder %s1204_s9, %s836_s13 }
 0x14c   : > { %406 = vadd.xlane.f32.xlu1 %v669_v11  ;;  %402 = vadd.xlane.f32.xlu0 %v666_v10  ;;  %p1316_p0 = scmp.ne.s32.totalorder %s1301_s29, 0  ;;  %s946_s19 = smov [#allocation7]  }
 0x14d   : > { %s840_s18 = sshll.u32 %s946_s19, 4  ;;  %s841_s18 = int_to_ptr.vmem [resolvable:$false] %s840_s18 }
 0x14e   : > { %p838_p3 = pnand %p837_p5, %p1316_p0  ;;  %s842_s12 = scalar_lea.vmem %s841_s18, 1024 }
 0x14f   : > { %p843_p9 = scmp.lt.s32.totalorder %s1204_s9, %s841_s18  ;;  %p844_p2 = scmp.lt.s32.totalorder %s842_s12, %s836_s13 }
 0x150   : > { %427 = vadd.xlane.f32.xlu1 %v422_v15  ;;  %425 = vadd.xlane.f32.xlu0 %v421_v16  ;;  %p839_p7 = pneg %p838_p3 }
 0x151   : > { %p845_p6 = por %p844_p2, %p843_p9 }
 0x153   : > { %p846_p10 = pnand %p845_p6, %p839_p7 }
 0x154   : > { %431 = vadd.xlane.f32.xlu1 %v424_v17  ;;  %429 = vadd.xlane.f32.xlu0 %v423_v18 }
 0x155   : > { %849 = shalt.err (!%p846_p10)
}
 0x156   : > { %s850_s1 = scalar_lea.hbm %s1202_s30, 512  ;;  %s854_s10 = scalar_lea.hbm %s1284_s2, 2048 }
 0x157   : > { %p851_p11 = scmp.ne.s32.totalorder %s1202_s30, %s850_s1  ;;  %p855_p8 = scmp.lt.u32.totalorder %s1202_s30, %s1284_s2 }
 0x158   : > { %p856_p12 = scmp.lt.u32.totalorder %s854_s10, %s850_s1  ;;  %p858_p5 = scmp.lt.u32.totalorder %s850_s1, %s1202_s30 }
 0x159   : > { %p852_p1 = pnand %p851_p11, %p1316_p0 }
 0x15a   : > { %p857_p13 = por %p856_p12, %p855_p8 }
 0x15b   : > { %p853_p4 = pneg %p852_p1 }
 0x15c   : > { %p859_p3 = por %p858_p5, %p857_p13 }
 0x15e   : > { %p860_p7 = pnand %p859_p3, %p853_p4 }
 0x160   : > { %863 = shalt.err (!%p860_p7)
}
 0x161   : > { %s947_s7 = smov 128   ;;  %s948_s11 = smov 256   ;;  %v398_v19 = vld [vmem:[%s1168_s24 + $0x10] sm:$0xff]  ;;  %v396_v20 = vld [vmem:[%s1168_s24] sm:$0xff]  ;;  %vm412_vm2 = vcmask 7168   ;;  %v399_v25 = vld [vmem:[%s1168_s24 + $0x18] sm:$0xff] }
 0x162   : > { %s949_s13 = smov 8   ;;  %v397_v26 = vld [vmem:[%s1168_s24 + $0x8] sm:$0xff]  ;;  %v417_v32 = vld [vmem:[%s1173_s28] sm:$0xff]  ;;  %v420_v37 = vld [vmem:[%s1173_s28 + $0x18] sm:$0xff] }
 0x163   : > { %688 = dma.vmem_to_hbm [thread:$0]  (%p1316_p0), %s1204_s9, 512, %s1202_s30, %s442_s5, %s947_s7, %s948_s11, %s949_s13  }
 0x164   : > { %v418_v31 = vld [vmem:[%s1173_s28 + $0x8] sm:$0xff]  ;;  %v419_v38 = vld [vmem:[%s1173_s28 + $0x10] sm:$0xff] }
 0x1d5   : > { %v405_v21 = vpop.xlane.xlu1 %404  ;;  %v401_v22 = vpop.xlane.xlu0 %400 }
 0x1d6   : > { %v410_v23 = vadd.f32 %v405_v21, %v398_v19  ;;  %v408_v24 = vadd.f32 %v401_v22, %v396_v20 }
 0x1d8   : > { %415 = vst.msk [vmem:[%s1168_s24 + $0x10] sm:$0xff] %vm412_vm2, %v410_v23  ;;  %413 = vst.msk [vmem:[%s1168_s24] sm:$0xff] %vm412_vm2, %v408_v24 }
 0x1d9   : > { %v407_v27 = vpop.xlane.xlu1 %406  ;;  %v403_v28 = vpop.xlane.xlu0 %402 }
 0x1da   : > { %v411_v29 = vadd.f32 %v407_v27, %v399_v25  ;;  %v409_v30 = vadd.f32 %v403_v28, %v397_v26 }
 0x1dc   : > { %416 = vst.msk [vmem:[%s1168_s24 + $0x18] sm:$0xff] %vm412_vm2, %v411_v29  ;;  %414 = vst.msk [vmem:[%s1168_s24 + $0x8] sm:$0xff] %vm412_vm2, %v409_v30 }
 0x1dd   : > { %v428_v33 = vpop.xlane.xlu1 %427  ;;  %v426_v34 = vpop.xlane.xlu0 %425 }
 0x1de   : > { %v434_v35 = vadd.f32 %v428_v33, %v418_v31  ;;  %v433_v36 = vadd.f32 %v426_v34, %v417_v32 }
 0x1e0   : > { %438 = vst.msk [vmem:[%s1173_s28 + $0x8] sm:$0xff] %vm412_vm2, %v434_v35  ;;  %437 = vst.msk [vmem:[%s1173_s28] sm:$0xff] %vm412_vm2, %v433_v36 }
 0x1e1   : > { %v432_v39 = vpop.xlane.xlu1 %431  ;;  %v430_v40 = vpop.xlane.xlu0 %429 }
 0x1e2   : > { %v436_v41 = vadd.f32 %v432_v39, %v420_v37  ;;  %v435_v42 = vadd.f32 %v430_v40, %v419_v38 }
 0x1e4   : > { %440 = vst.msk [vmem:[%s1173_s28 + $0x18] sm:$0xff] %vm412_vm2, %v436_v41  ;;  %439 = vst.msk [vmem:[%s1173_s28 + $0x10] sm:$0xff] %vm412_vm2, %v435_v42 }
 0x1e5 PF: > { %s1317_s29 = sld [smem:[#allocation11_spill]]  ;;  %p705_p0 = scmp.ge.s32.totalorder %s938_s22, 2 }
 0x1e6   : > { %s487_s23 = sand.u32 1, %s910_s15  }
 0x1e7   : > { %s488_s24 = scalar_lea.sflag [#allocation4], %s487_s23 }
 0x1eb   : > { %p1318_p9 = scmp.ne.s32.totalorder %s1317_s29, 0 }
 0x1ed   : > { %p699_p2 = pnand %p705_p0, %p1318_p9 }
 0x1ef   : > { %905 = dma.done.wait (!%p699_p2), %s488_s24, 512  }
 0x1f0   : > { %907 = vsyncadd (!%p699_p2), %s488_s24, 4294966784  ;;  %s22_s22 = sadd.s32 1, %s938_s22   ;;  %s1319_s28 = sld [smem:[#allocation12_spill]] }
 0x1f1   : > { %p19_p6 = scmp.ge.s32.totalorder %s22_s22, 6   ;;  %s1320_s15 = smov %s914_s16 }
 0x1f2   : > { %s1321_s16 = smov %s918_s17  ;;  %s1322_s17 = smov %s1144_s27 }
 0x1f3   : > { %s1323_s18 = smov %s930_s20  ;;  %s1324_s19 = smov %s934_s21 }
 0x1f4   : > { %s1326_s21 = smov %s1332_s14  ;;  %21 = sbr.rel (!%p19_p6) target bundleno = 10 (0xa), region = 105 }
 0x1f6   : > { %s1325_s20 = smov %s1319_s28 }
 0x1fb   :  { %509 = vsyncpa [#allocation3], 1 }
 0x1fc   :  { %511 = vsyncpa [#allocation3 + $0x1], 1 }
 0x1fd   :  { %512 = vsyncpa [#allocation6], 1 }
 0x1fe   :  { %513 = vsyncpa [#allocation4], 1 }
 0x1ff   :  { %515 = vsyncpa [#allocation4 + $0x1], 1 }

</bundles_post_ra>
